<compile_context>
chip_gen: v6e
topology: v6e:2x2x1
jax: 0.10.0
libtpu: 0.0.40
codegen_flags: <defaults>
</compile_context>

<pallas_src>
import numpy as np
import jax
import jax.numpy as jnp
from jax import lax
from jax.experimental import pallas as pl
from jax.experimental.pallas import tpu as pltpu


def _padded_bytes(shape, dtype):
    """Approximate VMEM footprint of `shape` after (8, 128) tile padding."""
    shape = tuple(int(s) for s in shape)
    if len(shape) == 1:
        shape = (1,) + shape
    lead = int(np.prod(shape[:-2])) if len(shape) > 2 else 1
    sub = -(-shape[-2] // 8) * 8
    lane = -(-shape[-1] // 128) * 128
    return lead * sub * lane * jnp.dtype(dtype).itemsize


def _make_fused_vgg_kernel(tb, length, group_channels):
    """Fused VGG forward for a fixed (batch_tile, L, group_channels) config."""
    n_groups = len(group_channels)

    def kernel(*refs):
        x_ref = refs[0]
        conv_refs = refs[1:1 + 2 * n_groups]       # (w (3,cin,cout) bf16, b (1,cout) f32)
        pool_ref = refs[1 + 2 * n_groups]          # (tb, tb*seq_final) bf16, 0/1 entries
        wc_ref = refs[2 + 2 * n_groups]            # (C, 128) bf16, lambdas folded in
        bc_ref = refs[3 + 2 * n_groups]            # (1, 128) f32
        o_ref = refs[4 + 2 * n_groups]             # (tb, 128) f32 lane-dense logits
        bufs = refs[5 + 2 * n_groups:]             # per-group f32 VMEM scratch

        x = x_ref[...]                             # (tb*L, Cin) f32, channels on lanes
        rows, seq = tb * length, length

        for g in range(n_groups):
            w_ref, b_ref = conv_refs[2 * g], conv_refs[2 * g + 1]

            # ---- "same" padding halo via XLU rotations; per-sample iota
            # masks zero the rows that wrapped across sample boundaries. -----
            prev = pltpu.roll(x, shift=1, axis=0)          # prev[i] = x[i-1]
            nxt = pltpu.roll(x, shift=rows - 1, axis=0)    # nxt[i]  = x[i+1]
            pos = lax.broadcasted_iota(jnp.int32, (rows, 1), 0) % seq
            prev = jnp.where(pos == 0, 0.0, prev)
            nxt = jnp.where(pos == seq - 1, 0.0, nxt)

            # ---- Conv1d(k=3, pad=1): three K=cin bf16 dots, f32 accumulation.
            acc = jnp.dot(prev.astype(jnp.bfloat16), w_ref[0],
                          preferred_element_type=jnp.float32)
            acc += jnp.dot(x.astype(jnp.bfloat16), w_ref[1],
                           preferred_element_type=jnp.float32)
            acc += jnp.dot(nxt.astype(jnp.bfloat16), w_ref[2],
                           preferred_element_type=jnp.float32)
            acc = jnp.maximum(acc + b_ref[...], 0.0)       # bias + ReLU (f32)

            # ---- MaxPool1d(2): pairwise max via roll, then ONE aligned
            # stride-2 sublane read from the VMEM scratch buffer. ------------
            buf = bufs[g]
            buf[...] = jnp.maximum(acc, pltpu.roll(acc, shift=rows - 1, axis=0))
            half = rows // 2
            x = buf[pl.ds(0, half, stride=2), :]           # (rows/2, cout) f32
            rows, seq = half, seq // 2

        # ---- Head: global average pool (host-built 0/1 matrix, 1/seq applied
        # in f32) + classifier with lambdas folded into the weights. ----------
        feat = jnp.dot(pool_ref[...], x.astype(jnp.bfloat16),
                       preferred_element_type=jnp.float32) * (1.0 / seq)
        out = jnp.dot(feat.astype(jnp.bfloat16), wc_ref[...],
                      preferred_element_type=jnp.float32) + bc_ref[...]
        o_ref[...] = out                                   # (tb, 128) lane-dense store

    return kernel


class VGGPallas:
    """Mirrors the PyTorch VGG wrapper (backbone groups + lambdas + classifier)."""

    def __init__(self, in_channels=4, group_channels=(8, 16), num_classes=10,
                 dropout=False, lmd=-1, repeat_input=1, seed=0, batch_tile=256):
        self.groups = len(group_channels)              # backbone.c_groups
        self.group_channels = tuple(group_channels)
        self.output_channels = group_channels[-1]      # backbone.output_channels
        self.num_classes = num_classes
        self.k_padded = -(-num_classes // 128) * 128   # lane-dense logits width
        self.repeat_input = repeat_input
        self.batch_tile = batch_tile
        assert self.output_channels % self.groups == 0, (
            "output_channels must be divisible by the number of groups")

        # --- lambdas: same logic as the torch module (deterministic RNG) ----
        rng = np.random.RandomState(0)
        if lmd < 0:
            lambdas = rng.normal(1, 0.3, size=self.groups)
            rmin = 0.2
            lambdas[lambdas < rmin] = rmin
            lambdas = lambdas / np.sum(lambdas)
        elif lmd == 0:
            lambdas = np.repeat(1, self.groups)
        else:
            lambdas = np.repeat(lmd, self.groups)
            lambdas = lambdas / np.sum(lambdas)
        lam = np.repeat(np.asarray(lambdas, np.float32),
                        self.output_channels // self.groups)

        # --- deterministic parameter init ------------------------------------
        # NOTE: conv weights are stored tap-major (k, Cin, Cout); importing
        # real PyTorch Conv1d weights ((Cout, Cin, k)) would need a transpose.
        key = jax.random.PRNGKey(seed)
        self.conv_params = []    # (weights bf16 (3, Cin, Cout), bias f32 (1, Cout))
        cin = in_channels * repeat_input
        for cout in group_channels:
            key, kw, kb = jax.random.split(key, 3)
            w = jax.random.normal(kw, (3, cin, cout), jnp.float32) / np.sqrt(3 * cin)
            b = 0.01 * jax.random.normal(kb, (cout,), jnp.float32)
            self.conv_params.append((w.astype(jnp.bfloat16), b.reshape(1, cout)))
            cin = cout
        key, kw, kb = jax.random.split(key, 3)
        wc = jax.random.normal(kw, (self.output_channels, num_classes),
                               jnp.float32) / np.sqrt(self.output_channels)
        bc = 0.01 * jax.random.normal(kb, (num_classes,), jnp.float32)
        # fold per-channel lambdas into the classifier weights, then zero-pad
        # the class axis to a multiple of 128 for an unmasked output store.
        wc = jnp.asarray(lam)[:, None] * wc
        pad = self.k_padded - num_classes
        self.wc = jnp.pad(wc.astype(jnp.bfloat16), ((0, 0), (0, pad)))
        self.bc = jnp.pad(bc.reshape(1, num_classes), ((0, 0), (0, pad)))

        # TODO(synk): nn.Dropout(p=0.8) omitted -- identity in eval mode; a
        # pltpu.prng_random_bits mask would implement train-mode dropout.

        self._forward_jit = jax.jit(self._forward)

    # -------------------------------------------------------------------------
    def _pick_batch_tile(self, n, L):
        # Footprint-driven cap: lane padding makes every activation row cost a
        # full 128-lane vreg row regardless of cout, so keep the slab <= ~4K
        # rows (comfortably inside v7x's 64 MiB VMEM, tiny for v5e/v6e).
        # TODO(synk): add an L-tiled grid axis (2-row halo) once tb*L grows
        # past ~16K rows (very long sequences on v7x).
        cap = max(8, min(self.batch_tile, 4096 // max(L, 1)))
        if n >= 16:
            # prefer >= 2 grid steps so v7x's two TensorCores both get work
            for t in range(min(cap, n // 2), 7, -1):
                if n % t == 0 and t % 8 == 0:
                    return t
        if n <= cap:
            return n
        for t in range(cap, 7, -1):        # sublane-aligned divisor of n
            if n % t == 0 and t % 8 == 0:
                return t
        return n                           # fall back: whole batch in one block

    def _vmem_limit_bytes(self, tb, L, C):
        seq_final = L // (2 ** self.groups)
        total = 2 * _padded_bytes((tb * L, C), jnp.float32)            # input (2 bufs)
        for w, b in self.conv_params:
            total += 2 * (_padded_bytes(w.shape, jnp.bfloat16)
                          + _padded_bytes(b.shape, jnp.float32))
        total += 2 * _padded_bytes((tb, tb * seq_final), jnp.bfloat16)  # pool matrix
        total += 2 * (_padded_bytes(self.wc.shape, jnp.bfloat16)
                      + _padded_bytes(self.bc.shape, jnp.float32))
        total += 2 * _padded_bytes((tb, self.k_padded), jnp.float32)   # logits blocks
        seq, largest = L, 0
        for cout in self.group_channels:
            sb = _padded_bytes((tb * seq, cout), jnp.float32)          # pool scratch
            total += sb
            largest = max(largest, sb)
            seq //= 2
        # allowance for in-kernel temporaries (prev/nxt/acc/bf16 operands) and
        # ~25% headroom for compiler temporaries; no blanket multi-10MiB ask.
        total = int((total + 4 * largest) * 1.25)
        return int(min(max(total, 8 * 1024 * 1024), 100 * 1024 * 1024))

    # -------------------------------------------------------------------------
    def _forward(self, x_ncl):
        # x_ncl: (N, C, L), the PyTorch 1-D signal convention.
        if self.repeat_input > 1:
            x_ncl = jnp.tile(x_ncl, (1, self.repeat_input, 1))     # x.repeat(1, r, 1)
        N, C, L = x_ncl.shape
        assert L % (2 ** self.groups) == 0, "L must be divisible by 2**groups"

        # NCL -> NLC (channels on lanes), fold batch into matmul rows; keep f32
        # inside the kernel (bf16 only as MXU operands).
        x = jnp.transpose(x_ncl, (0, 2, 1)).reshape(N * L, C).astype(jnp.float32)

        tb = self._pick_batch_tile(N, L)
        grid = (N // tb,)
        seq_final = L // (2 ** self.groups)

        # Host-built 0/1 average-pool matrix (block diagonal, one row / sample);
        # the 1/seq scale is applied in f32 inside the kernel.
        pool_mat = jnp.asarray(
            np.kron(np.eye(tb, dtype=np.float32),
                    np.ones((1, seq_final), np.float32)), jnp.bfloat16)

        kernel = _make_fused_vgg_kernel(tb, L, self.group_channels)

        in_specs = [pl.BlockSpec((tb * L, C), lambda n: (n, 0))]
        inputs = [x]
        for w, b in self.conv_params:
            in_specs.append(pl.BlockSpec(w.shape, lambda n: (0, 0, 0)))
            in_specs.append(pl.BlockSpec(b.shape, lambda n: (0, 0)))
            inputs.extend([w, b])
        # Constant-index blocks below are DMA'd once: the pipeline does not
        # re-fetch a block whose index_map output is unchanged between steps.
        in_specs.append(pl.BlockSpec(pool_mat.shape, lambda n: (0, 0)))
        in_specs.append(pl.BlockSpec(self.wc.shape, lambda n: (0, 0)))
        in_specs.append(pl.BlockSpec(self.bc.shape, lambda n: (0, 0)))
        inputs.extend([pool_mat, self.wc, self.bc])

        # VMEM scratch holding each group's pre-pool conv output (f32).
        scratch, seq = [], L
        for cout in self.group_channels:
            scratch.append(pltpu.VMEM((tb * seq, cout), jnp.float32))
            seq //= 2

        logits = pl.pallas_call(
            kernel,
            out_shape=jax.ShapeDtypeStruct((N, self.k_padded), jnp.float32),
            grid=grid,
            in_specs=in_specs,
            out_specs=pl.BlockSpec((tb, self.k_padded), lambda n: (n, 0)),
            scratch_shapes=scratch,
            compiler_params=pltpu.CompilerParams(
                dimension_semantics=("parallel",),     # batch axis: megacore-friendly
                vmem_limit_bytes=self._vmem_limit_bytes(tb, L, C)),
        )(*inputs)
        return logits[:, :self.num_classes]

    def __call__(self, x_ncl):
        return self._forward_jit(x_ncl)


if __name__ == "__main__":
    model = VGGPallas(in_channels=4, group_channels=(8, 16), num_classes=10,
                      dropout=False, lmd=-1, repeat_input=1, seed=0)
    key = jax.random.PRNGKey(0)
    x = jax.random.normal(key, (2, 4, 16), jnp.float32)    # (batch, channels, length)
    out = model(x)
    jax.block_until_ready(out)
    assert out.shape == (2, 10) and out.dtype == jnp.float32
    print("KERNEL_OK")
</pallas_src>

<mosaic_0001>
module attributes {stable_mosaic.version = 11 : i64} {
  func.func @kernel(%arg0: i32, %arg1: memref<32x4xf32, #tpu.memory_space<vmem>>, %arg2: memref<3x4x8xbf16, #tpu.memory_space<vmem>>, %arg3: memref<1x8xf32, #tpu.memory_space<vmem>>, %arg4: memref<3x8x16xbf16, #tpu.memory_space<vmem>>, %arg5: memref<1x16xf32, #tpu.memory_space<vmem>>, %arg6: memref<2x8xbf16, #tpu.memory_space<vmem>>, %arg7: memref<16x128xbf16, #tpu.memory_space<vmem>>, %arg8: memref<1x128xf32, #tpu.memory_space<vmem>>, %arg9: memref<2x128xf32, #tpu.memory_space<vmem>>, %arg10: memref<32x8xf32, #tpu.memory_space<vmem>>, %arg11: memref<16x16xf32, #tpu.memory_space<vmem>>) attributes {dimension_semantics = [#tpu.dimension_semantics<parallel>], iteration_bounds = array<i64: 1>, scalar_prefetch = 0 : i64, scratch_operands = 2 : i64, tpu.core_type = #tpu.core_type<tc>, window_params = [{transform_indices = @transform_0, window_bounds = array<i64: 32, 4>}, {pipeline_mode = #tpu.pipeline_mode<synchronous>, transform_indices = @transform_1, window_bounds = array<i64: 3, 4, 8>}, {pipeline_mode = #tpu.pipeline_mode<synchronous>, transform_indices = @transform_2, window_bounds = array<i64: 1, 8>}, {pipeline_mode = #tpu.pipeline_mode<synchronous>, transform_indices = @transform_3, window_bounds = array<i64: 3, 8, 16>}, {pipeline_mode = #tpu.pipeline_mode<synchronous>, transform_indices = @transform_4, window_bounds = array<i64: 1, 16>}, {pipeline_mode = #tpu.pipeline_mode<synchronous>, transform_indices = @transform_5, window_bounds = array<i64: 2, 8>}, {pipeline_mode = #tpu.pipeline_mode<synchronous>, transform_indices = @transform_6, window_bounds = array<i64: 16, 128>}, {pipeline_mode = #tpu.pipeline_mode<synchronous>, transform_indices = @transform_7, window_bounds = array<i64: 1, 128>}, {transform_indices = @transform_8, window_bounds = array<i64: 2, 128>}]} {
    %c0 = arith.constant 0 : index
    %c0_0 = arith.constant 0 : index
    %0 = vector.load %arg1[%c0, %c0_0] : memref<32x4xf32, #tpu.memory_space<vmem>>, vector<32x4xf32>
    %c1_i32 = arith.constant 1 : i32
    %1 = tpu.dynamic_rotate %0 by %c1_i32 dim 0 : vector<32x4xf32>, i32 -> vector<32x4xf32>
    %c31_i32 = arith.constant 31 : i32
    %2 = tpu.dynamic_rotate %0 by %c31_i32 dim 0 : vector<32x4xf32>, i32 -> vector<32x4xf32>
    %3 = tpu.iota {dimensions = array<i32: 0>} : vector<32x1xi32>
    %c16_i32 = arith.constant 16 : i32
    %c0_i32 = arith.constant 0 : i32
    %4 = arith.cmpi eq, %c16_i32, %c0_i32 : i32
    %c1_i32_1 = arith.constant 1 : i32
    %5 = arith.select %4, %c1_i32_1, %c16_i32 : i32
    %6 = vector.broadcast %5 : i32 to vector<32x1xi32>
    %7 = arith.remsi %3, %6 : vector<32x1xi32>
    %c0_i32_2 = arith.constant 0 : i32
    %8 = vector.broadcast %c0_i32_2 : i32 to vector<32x1xi32>
    %9 = arith.cmpi ne, %7, %8 : vector<32x1xi32>
    %c0_i32_3 = arith.constant 0 : i32
    %10 = vector.broadcast %c0_i32_3 : i32 to vector<32x1xi32>
    %11 = arith.cmpi slt, %7, %10 : vector<32x1xi32>
    %c0_i32_4 = arith.constant 0 : i32
    %12 = arith.cmpi slt, %5, %c0_i32_4 : i32
    %13 = vector.broadcast %12 : i1 to vector<32x1xi1>
    %14 = vector.broadcast %13 : vector<32x1xi1> to vector<32x1xi1>
    %15 = arith.xori %11, %14 : vector<32x1xi1>
    %16 = arith.andi %15, %9 : vector<32x1xi1>
    %17 = vector.broadcast %5 : i32 to vector<32x1xi32>
    %18 = arith.addi %7, %17 : vector<32x1xi32>
    %19 = arith.select %16, %18, %7 : vector<32x1xi1>, vector<32x1xi32>
    %c0_i32_5 = arith.constant 0 : i32
    %20 = vector.broadcast %c0_i32_5 : i32 to vector<32x1xi32>
    %21 = arith.cmpi eq, %19, %20 : vector<32x1xi32>
    %cst = arith.constant 0.000000e+00 : f32
    %22 = vector.shape_cast %21 : vector<32x1xi1> to vector<32x1xi1>
    %23 = vector.broadcast %22 : vector<32x1xi1> to vector<32x4xi1>
    %24 = vector.broadcast %cst : f32 to vector<32x4xf32>
    %25 = arith.select %23, %24, %1 : vector<32x4xi1>, vector<32x4xf32>
    %c15_i32 = arith.constant 15 : i32
    %26 = vector.broadcast %c15_i32 : i32 to vector<32x1xi32>
    %27 = arith.cmpi eq, %19, %26 : vector<32x1xi32>
    %cst_6 = arith.constant 0.000000e+00 : f32
    %28 = vector.shape_cast %27 : vector<32x1xi1> to vector<32x1xi1>
    %29 = vector.broadcast %28 : vector<32x1xi1> to vector<32x4xi1>
    %30 = vector.broadcast %cst_6 : f32 to vector<32x4xf32>
    %31 = arith.select %29, %30, %2 : vector<32x4xi1>, vector<32x4xf32>
    %32 = arith.truncf %25 : vector<32x4xf32> to vector<32x4xbf16>
    %c0_7 = arith.constant 0 : index
    %c0_8 = arith.constant 0 : index
    %c0_9 = arith.constant 0 : index
    %33 = vector.load %arg2[%c0_7, %c0_8, %c0_9] : memref<3x4x8xbf16, #tpu.memory_space<vmem>>, vector<1x4x8xbf16>
    %34 = vector.shape_cast %33 : vector<1x4x8xbf16> to vector<4x8xbf16>
    %cst_10 = arith.constant dense<0.000000e+00> : vector<32x8xf32>
    %35 = tpu.matmul %32, %34, %cst_10 {dimension_numbers = #tpu.dot_dimension_numbers<[1], [0], [0], [1], [0, 0, 1, 1], [], []>} : vector<32x4xbf16>, vector<4x8xbf16>, vector<32x8xf32> -> vector<32x8xf32>
    %36 = arith.truncf %0 : vector<32x4xf32> to vector<32x4xbf16>
    %c1 = arith.constant 1 : index
    %c0_11 = arith.constant 0 : index
    %c0_12 = arith.constant 0 : index
    %37 = vector.load %arg2[%c1, %c0_11, %c0_12] : memref<3x4x8xbf16, #tpu.memory_space<vmem>>, vector<1x4x8xbf16>
    %38 = vector.shape_cast %37 : vector<1x4x8xbf16> to vector<4x8xbf16>
    %cst_13 = arith.constant dense<0.000000e+00> : vector<32x8xf32>
    %39 = tpu.matmul %36, %38, %cst_13 {dimension_numbers = #tpu.dot_dimension_numbers<[1], [0], [0], [1], [0, 0, 1, 1], [], []>} : vector<32x4xbf16>, vector<4x8xbf16>, vector<32x8xf32> -> vector<32x8xf32>
    %40 = arith.addf %35, %39 : vector<32x8xf32>
    %41 = arith.truncf %31 : vector<32x4xf32> to vector<32x4xbf16>
    %c2 = arith.constant 2 : index
    %c0_14 = arith.constant 0 : index
    %c0_15 = arith.constant 0 : index
    %42 = vector.load %arg2[%c2, %c0_14, %c0_15] : memref<3x4x8xbf16, #tpu.memory_space<vmem>>, vector<1x4x8xbf16>
    %43 = vector.shape_cast %42 : vector<1x4x8xbf16> to vector<4x8xbf16>
    %cst_16 = arith.constant dense<0.000000e+00> : vector<32x8xf32>
    %44 = tpu.matmul %41, %43, %cst_16 {dimension_numbers = #tpu.dot_dimension_numbers<[1], [0], [0], [1], [0, 0, 1, 1], [], []>} : vector<32x4xbf16>, vector<4x8xbf16>, vector<32x8xf32> -> vector<32x8xf32>
    %45 = arith.addf %40, %44 : vector<32x8xf32>
    %c0_17 = arith.constant 0 : index
    %c0_18 = arith.constant 0 : index
    %46 = vector.load %arg3[%c0_17, %c0_18] : memref<1x8xf32, #tpu.memory_space<vmem>>, vector<1x8xf32>
    %47 = vector.broadcast %46 : vector<1x8xf32> to vector<32x8xf32>
    %48 = arith.addf %45, %47 : vector<32x8xf32>
    %cst_19 = arith.constant 0.000000e+00 : f32
    %49 = vector.broadcast %cst_19 : f32 to vector<32x8xf32>
    %50 = arith.maximumf %48, %49 : vector<32x8xf32>
    %c31_i32_20 = arith.constant 31 : i32
    %51 = tpu.dynamic_rotate %50 by %c31_i32_20 dim 0 : vector<32x8xf32>, i32 -> vector<32x8xf32>
    %52 = arith.maximumf %50, %51 : vector<32x8xf32>
    %c0_21 = arith.constant 0 : index
    %c0_22 = arith.constant 0 : index
    %53 = vector.load %arg10[%c0_21, %c0_22] : memref<32x8xf32, #tpu.memory_space<vmem>>, vector<32x8xf32>
    tpu.vector_store %arg10[%c0_21, %c0_22], %52 {strides = array<i32>} : memref<32x8xf32, #tpu.memory_space<vmem>>, vector<32x8xf32>,
    %c0_23 = arith.constant 0 : index
    %c0_24 = arith.constant 0 : index
    %54 = tpu.strided_load %arg10[%c0_23, %c0_24] {strides = array<i32: 2, 1>} : memref<32x8xf32, #tpu.memory_space<vmem>>, vector<16x8xf32>
    %c1_i32_25 = arith.constant 1 : i32
    %55 = tpu.dynamic_rotate %54 by %c1_i32_25 dim 0 : vector<16x8xf32>, i32 -> vector<16x8xf32>
    %c15_i32_26 = arith.constant 15 : i32
    %56 = tpu.dynamic_rotate %54 by %c15_i32_26 dim 0 : vector<16x8xf32>, i32 -> vector<16x8xf32>
    %57 = tpu.iota {dimensions = array<i32: 0>} : vector<16x1xi32>
    %c8_i32 = arith.constant 8 : i32
    %c0_i32_27 = arith.constant 0 : i32
    %58 = arith.cmpi eq, %c8_i32, %c0_i32_27 : i32
    %c1_i32_28 = arith.constant 1 : i32
    %59 = arith.select %58, %c1_i32_28, %c8_i32 : i32
    %60 = vector.broadcast %59 : i32 to vector<16x1xi32>
    %61 = arith.remsi %57, %60 : vector<16x1xi32>
    %c0_i32_29 = arith.constant 0 : i32
    %62 = vector.broadcast %c0_i32_29 : i32 to vector<16x1xi32>
    %63 = arith.cmpi ne, %61, %62 : vector<16x1xi32>
    %c0_i32_30 = arith.constant 0 : i32
    %64 = vector.broadcast %c0_i32_30 : i32 to vector<16x1xi32>
    %65 = arith.cmpi slt, %61, %64 : vector<16x1xi32>
    %c0_i32_31 = arith.constant 0 : i32
    %66 = arith.cmpi slt, %59, %c0_i32_31 : i32
    %67 = vector.broadcast %66 : i1 to vector<16x1xi1>
    %68 = vector.broadcast %67 : vector<16x1xi1> to vector<16x1xi1>
    %69 = arith.xori %65, %68 : vector<16x1xi1>
    %70 = arith.andi %69, %63 : vector<16x1xi1>
    %71 = vector.broadcast %59 : i32 to vector<16x1xi32>
    %72 = arith.addi %61, %71 : vector<16x1xi32>
    %73 = arith.select %70, %72, %61 : vector<16x1xi1>, vector<16x1xi32>
    %c0_i32_32 = arith.constant 0 : i32
    %74 = vector.broadcast %c0_i32_32 : i32 to vector<16x1xi32>
    %75 = arith.cmpi eq, %73, %74 : vector<16x1xi32>
    %cst_33 = arith.constant 0.000000e+00 : f32
    %76 = vector.shape_cast %75 : vector<16x1xi1> to vector<16x1xi1>
    %77 = vector.broadcast %76 : vector<16x1xi1> to vector<16x8xi1>
    %78 = vector.broadcast %cst_33 : f32 to vector<16x8xf32>
    %79 = arith.select %77, %78, %55 : vector<16x8xi1>, vector<16x8xf32>
    %c7_i32 = arith.constant 7 : i32
    %80 = vector.broadcast %c7_i32 : i32 to vector<16x1xi32>
    %81 = arith.cmpi eq, %73, %80 : vector<16x1xi32>
    %cst_34 = arith.constant 0.000000e+00 : f32
    %82 = vector.shape_cast %81 : vector<16x1xi1> to vector<16x1xi1>
    %83 = vector.broadcast %82 : vector<16x1xi1> to vector<16x8xi1>
    %84 = vector.broadcast %cst_34 : f32 to vector<16x8xf32>
    %85 = arith.select %83, %84, %56 : vector<16x8xi1>, vector<16x8xf32>
    %86 = arith.truncf %79 : vector<16x8xf32> to vector<16x8xbf16>
    %c0_35 = arith.constant 0 : index
    %c0_36 = arith.constant 0 : index
    %c0_37 = arith.constant 0 : index
    %87 = vector.load %arg4[%c0_35, %c0_36, %c0_37] : memref<3x8x16xbf16, #tpu.memory_space<vmem>>, vector<1x8x16xbf16>
    %88 = vector.shape_cast %87 : vector<1x8x16xbf16> to vector<8x16xbf16>
    %cst_38 = arith.constant dense<0.000000e+00> : vector<16x16xf32>
    %89 = tpu.matmul %86, %88, %cst_38 {dimension_numbers = #tpu.dot_dimension_numbers<[1], [0], [0], [1], [0, 0, 1, 1], [], []>} : vector<16x8xbf16>, vector<8x16xbf16>, vector<16x16xf32> -> vector<16x16xf32>
    %90 = arith.truncf %54 : vector<16x8xf32> to vector<16x8xbf16>
    %c1_39 = arith.constant 1 : index
    %c0_40 = arith.constant 0 : index
    %c0_41 = arith.constant 0 : index
    %91 = vector.load %arg4[%c1_39, %c0_40, %c0_41] : memref<3x8x16xbf16, #tpu.memory_space<vmem>>, vector<1x8x16xbf16>
    %92 = vector.shape_cast %91 : vector<1x8x16xbf16> to vector<8x16xbf16>
    %cst_42 = arith.constant dense<0.000000e+00> : vector<16x16xf32>
    %93 = tpu.matmul %90, %92, %cst_42 {dimension_numbers = #tpu.dot_dimension_numbers<[1], [0], [0], [1], [0, 0, 1, 1], [], []>} : vector<16x8xbf16>, vector<8x16xbf16>, vector<16x16xf32> -> vector<16x16xf32>
    %94 = arith.addf %89, %93 : vector<16x16xf32>
    %95 = arith.truncf %85 : vector<16x8xf32> to vector<16x8xbf16>
    %c2_43 = arith.constant 2 : index
    %c0_44 = arith.constant 0 : index
    %c0_45 = arith.constant 0 : index
    %96 = vector.load %arg4[%c2_43, %c0_44, %c0_45] : memref<3x8x16xbf16, #tpu.memory_space<vmem>>, vector<1x8x16xbf16>
    %97 = vector.shape_cast %96 : vector<1x8x16xbf16> to vector<8x16xbf16>
    %cst_46 = arith.constant dense<0.000000e+00> : vector<16x16xf32>
    %98 = tpu.matmul %95, %97, %cst_46 {dimension_numbers = #tpu.dot_dimension_numbers<[1], [0], [0], [1], [0, 0, 1, 1], [], []>} : vector<16x8xbf16>, vector<8x16xbf16>, vector<16x16xf32> -> vector<16x16xf32>
    %99 = arith.addf %94, %98 : vector<16x16xf32>
    %c0_47 = arith.constant 0 : index
    %c0_48 = arith.constant 0 : index
    %100 = vector.load %arg5[%c0_47, %c0_48] : memref<1x16xf32, #tpu.memory_space<vmem>>, vector<1x16xf32>
    %101 = vector.broadcast %100 : vector<1x16xf32> to vector<16x16xf32>
    %102 = arith.addf %99, %101 : vector<16x16xf32>
    %cst_49 = arith.constant 0.000000e+00 : f32
    %103 = vector.broadcast %cst_49 : f32 to vector<16x16xf32>
    %104 = arith.maximumf %102, %103 : vector<16x16xf32>
    %c15_i32_50 = arith.constant 15 : i32
    %105 = tpu.dynamic_rotate %104 by %c15_i32_50 dim 0 : vector<16x16xf32>, i32 -> vector<16x16xf32>
    %106 = arith.maximumf %104, %105 : vector<16x16xf32>
    %c0_51 = arith.constant 0 : index
    %c0_52 = arith.constant 0 : index
    %107 = vector.load %arg11[%c0_51, %c0_52] : memref<16x16xf32, #tpu.memory_space<vmem>>, vector<16x16xf32>
    tpu.vector_store %arg11[%c0_51, %c0_52], %106 {strides = array<i32>} : memref<16x16xf32, #tpu.memory_space<vmem>>, vector<16x16xf32>,
    %c0_53 = arith.constant 0 : index
    %c0_54 = arith.constant 0 : index
    %108 = tpu.strided_load %arg11[%c0_53, %c0_54] {strides = array<i32: 2, 1>} : memref<16x16xf32, #tpu.memory_space<vmem>>, vector<8x16xf32>
    %c0_55 = arith.constant 0 : index
    %c0_56 = arith.constant 0 : index
    %109 = vector.load %arg6[%c0_55, %c0_56] : memref<2x8xbf16, #tpu.memory_space<vmem>>, vector<2x8xbf16>
    %110 = arith.truncf %108 : vector<8x16xf32> to vector<8x16xbf16>
    %cst_57 = arith.constant dense<0.000000e+00> : vector<2x16xf32>
    %111 = tpu.matmul %109, %110, %cst_57 {dimension_numbers = #tpu.dot_dimension_numbers<[1], [0], [0], [1], [0, 0, 1, 1], [], []>} : vector<2x8xbf16>, vector<8x16xbf16>, vector<2x16xf32> -> vector<2x16xf32>
    %cst_58 = arith.constant 2.500000e-01 : f32
    %112 = vector.broadcast %cst_58 : f32 to vector<2x16xf32>
    %113 = arith.mulf %111, %112 : vector<2x16xf32>
    %114 = arith.truncf %113 : vector<2x16xf32> to vector<2x16xbf16>
    %c0_59 = arith.constant 0 : index
    %c0_60 = arith.constant 0 : index
    %115 = vector.load %arg7[%c0_59, %c0_60] : memref<16x128xbf16, #tpu.memory_space<vmem>>, vector<16x128xbf16>
    %cst_61 = arith.constant dense<0.000000e+00> : vector<2x128xf32>
    %116 = tpu.matmul %114, %115, %cst_61 {dimension_numbers = #tpu.dot_dimension_numbers<[1], [0], [0], [1], [0, 0, 1, 1], [], []>} : vector<2x16xbf16>, vector<16x128xbf16>, vector<2x128xf32> -> vector<2x128xf32>
    %c0_62 = arith.constant 0 : index
    %c0_63 = arith.constant 0 : index
    %117 = vector.load %arg8[%c0_62, %c0_63] : memref<1x128xf32, #tpu.memory_space<vmem>>, vector<1x128xf32>
    %118 = vector.broadcast %117 : vector<1x128xf32> to vector<2x128xf32>
    %119 = arith.addf %116, %118 : vector<2x128xf32>
    %c0_64 = arith.constant 0 : index
    %c0_65 = arith.constant 0 : index
    %120 = vector.load %arg9[%c0_64, %c0_65] : memref<2x128xf32, #tpu.memory_space<vmem>>, vector<2x128xf32>
    tpu.vector_store %arg9[%c0_64, %c0_65], %119 {strides = array<i32>} : memref<2x128xf32, #tpu.memory_space<vmem>>, vector<2x128xf32>,
    return
  }
  func.func @transform_0(%arg0: i32) -> (i32, i32) {
    %c0_i32 = arith.constant 0 : i32
    %c0_i32_0 = arith.constant 0 : i32
    return %arg0, %c0_i32 : i32, i32
  }
  func.func @transform_1(%arg0: i32) -> (i32, i32, i32) {
    %c0_i32 = arith.constant 0 : i32
    %c0_i32_0 = arith.constant 0 : i32
    %c0_i32_1 = arith.constant 0 : i32
    %c0_i32_2 = arith.constant 0 : i32
    return %c0_i32, %c0_i32_0, %c0_i32_1 : i32, i32, i32
  }
  func.func @transform_2(%arg0: i32) -> (i32, i32) {
    %c0_i32 = arith.constant 0 : i32
    %c0_i32_0 = arith.constant 0 : i32
    %c0_i32_1 = arith.constant 0 : i32
    return %c0_i32, %c0_i32_0 : i32, i32
  }
  func.func @transform_3(%arg0: i32) -> (i32, i32, i32) {
    %c0_i32 = arith.constant 0 : i32
    %c0_i32_0 = arith.constant 0 : i32
    %c0_i32_1 = arith.constant 0 : i32
    %c0_i32_2 = arith.constant 0 : i32
    return %c0_i32, %c0_i32_0, %c0_i32_1 : i32, i32, i32
  }
  func.func @transform_4(%arg0: i32) -> (i32, i32) {
    %c0_i32 = arith.constant 0 : i32
    %c0_i32_0 = arith.constant 0 : i32
    %c0_i32_1 = arith.constant 0 : i32
    return %c0_i32, %c0_i32_0 : i32, i32
  }
  func.func @transform_5(%arg0: i32) -> (i32, i32) {
    %c0_i32 = arith.constant 0 : i32
    %c0_i32_0 = arith.constant 0 : i32
    %c0_i32_1 = arith.constant 0 : i32
    return %c0_i32, %c0_i32_0 : i32, i32
  }
  func.func @transform_6(%arg0: i32) -> (i32, i32) {
    %c0_i32 = arith.constant 0 : i32
    %c0_i32_0 = arith.constant 0 : i32
    %c0_i32_1 = arith.constant 0 : i32
    return %c0_i32, %c0_i32_0 : i32, i32
  }
  func.func @transform_7(%arg0: i32) -> (i32, i32) {
    %c0_i32 = arith.constant 0 : i32
    %c0_i32_0 = arith.constant 0 : i32
    %c0_i32_1 = arith.constant 0 : i32
    return %c0_i32, %c0_i32_0 : i32, i32
  }
  func.func @transform_8(%arg0: i32) -> (i32, i32) {
    %c0_i32 = arith.constant 0 : i32
    %c0_i32_0 = arith.constant 0 : i32
    return %arg0, %c0_i32 : i32, i32
  }
}

</mosaic_0001>

<bundles_post_ra>
// kernel: _forward.1
= control target key start
LH: loop header
LB: loop body
LE: loop exit
PB: predicated region body
PF: predicated region fallthrough
CT: control target
= control target key end

     0   :  { %vm152_vm0 = vcmask 1041408   ;;  %v39_v3 = vlaneseq  ;;  %vm145_vm1 = vcmask 31744   ;;  %s1034_s0 = inlined_call_operand.vmem [shape: f32[32,4], index: 0, kind: input, shape index: {}]   ;;  %s1035_s1 = inlined_call_operand.vmem [shape: bf16[3,4,8], index: 1, kind: input, shape index: {}]   ;;  %s1036_s2 = inlined_call_operand.vmem [shape: f32[1,8], index: 2, kind: input, shape index: {}]   ;;  %s1037_s3 = inlined_call_operand.vmem [shape: bf16[3,8,16], index: 3, kind: input, shape index: {}]   ;;  %s1038_s4 = inlined_call_operand.vmem [shape: f32[1,16], index: 4, kind: input, shape index: {}]   ;;  %s1039_s5 = inlined_call_operand.vmem [shape: bf16[2,8], index: 5, kind: input, shape index: {}]   ;;  %s1040_s6 = inlined_call_operand.vmem [shape: bf16[16,128], index: 6, kind: input, shape index: {}]   ;;  %s1041_s7 = inlined_call_operand.vmem [shape: f32[1,128], index: 7, kind: input, shape index: {}]   ;;  %s1042_s8 = inlined_call_operand.hbm [shape: f32[2,128], index: 8, kind: output, shape index: {}]  }
   0x1   :  { %v708_v0 = vld [vmem:[%s1035_s1 + $0x2] sm:$0x3]  ;;  %v32_v2 = vld [vmem:[%s1034_s0 + $0x8] sm:$0xff]  ;;  %v33_v5 = vld [vmem:[%s1034_s0 + $0x10] sm:$0xff] }
   0x2   :  { %v31_v1 = vld [vmem:[%s1034_s0] sm:$0xff]  ;;  %794 = vmatprep.subr.msk.bf16.mxu0 %vm152_vm0, %v708_v0  ;;  %v154_v4 = vsel %vm152_vm0, %v708_v0, 0  ;;  %v34_v6 = vld [vmem:[%s1034_s0 + $0x18] sm:$0xff]  ;;  %v36_v8 = vrot.slane %v32_v2, 7  ;;  %v37_v11 = vrot.slane %v33_v5, 7  ;;  %v898_v17 = vshrl.u32 %v39_v3, 7 }
   0x3   :  { %747 = vmatpush3.bf16.msra.mxu0 %v154_v4  ;;  %v35_v7 = vrot.slane %v31_v1, 7  ;;  %v141_v9 = vpack.c.bf16 %v32_v2, %v31_v1  ;;  %v140_v10 = vld [vmem:[%s1035_s1] sm:$0x3]  ;;  %v142_v12 = vpack.c.bf16 %v34_v6, %v33_v5  ;;  %v713_v14 = vld [vmem:[%s1035_s1 + $0x4] sm:$0x3]  ;;  %v38_v15 = vrot.slane %v34_v6, 7 }
   0x4   :  { %795 = vmatprep.subr.msk.bf16.mxu1 %vm152_vm0, %v140_v10  ;;  %v212_v13 = vsel %vm152_vm0, %v140_v10, 0  ;;  %v274_v16 = vsel %vm152_vm0, %v713_v14, 0  ;;  %v46_v18 = vrot.slane %v31_v1, 1  ;;  %796 = vmatprep.subr.msk.bf16.mxu0 %vm152_vm0, %v713_v14 }
   0x5   :  { %748 = vmatprep.mubr.msk.bf16.mxu0 %vm145_vm1, %v141_v9  ;;  %753 = vmatpush3.bf16.msra.mxu1 %v212_v13 }
   0x6   :  { %749 = vmatmul.mubr.msk.bf16.vlgmr.msra.gmra.mxu0 %vm145_vm1, %v142_v12 }
   0x7   :  { %13 = vsyncpa [#allocation5], 0  ;;  %v47_v19 = vrot.slane %v32_v2, 1  ;;  %759 = vmatpush3.bf16.msra.mxu0 %v274_v16  ;;  %vm41_vm2 = vcmp.lt.s32.totalorder %v898_v17, 1  ;;  %v62_v20 = vand.u32 15, %v898_v17  ;;  %v56_v21 = vadd.s32 16, %v898_v17 }
   0x8   :  { %v48_v22 = vrot.slane %v33_v5, 1  ;;  %v49_v23 = vrot.slane %v34_v6, 1  ;;  %v44_v24 = vsel %vm41_vm2, %v35_v7, %v36_v8  ;;  %v45_v25 = vsel %vm41_vm2, %v38_v15, %v35_v7  ;;  %v717_v45 = vld [vmem:[%s1037_s3 + $0x4] sm:$0xf]  ;;  %v413_v48 = vld [vmem:[%s1037_s3] sm:$0xf] }
   0x9   :  { %vm106_vm3 = vcmp.eq.s32.totalorder %v62_v20, 0  ;;  %v43_v26 = vsel %vm41_vm2, %v36_v8, %v37_v11  ;;  %v76_v27 = vand.u32 15, %v56_v21  ;;  %vm50_vm4 = vcmp.lt.s32.totalorder %v898_v17, 7  ;;  %v716_v59 = vld [vmem:[%s1036_s2] ss:$0 sm:$0xff] }
   0xa   :  { %v118_v28 = vsel %vm106_vm3, 0.0, %v45_v25  ;;  %v42_v29 = vsel %vm41_vm2, %v37_v11, %v38_v15  ;;  %v915_v30 = vadd.s32 8, %v898_v17  ;;  %v57_v32 = vadd.s32 24, %v898_v17 }
   0xb   :  { %v138_v31 = vpack.c.bf16 %v44_v24, %v118_v28  ;;  %vm108_vm5 = vcmp.eq.s32.totalorder %v76_v27, 0  ;;  %v52_v34 = vsel %vm50_vm4, %v47_v19, %v48_v22  ;;  %v53_v37 = vsel %vm50_vm4, %v46_v18, %v47_v19 }
   0xc   :  { %v120_v33 = vsel %vm108_vm5, 0.0, %v43_v26  ;;  %v69_v35 = vand.u32 15, %v915_v30  ;;  %v54_v38 = vsel %vm50_vm4, %v49_v23, %v46_v18  ;;  %v83_v39 = vand.u32 15, %v57_v32 }
   0xd   :  { %754 = vmatprep.mubr.msk.bf16.mxu1 %vm145_vm1, %v138_v31  ;;  %v139_v36 = vpack.c.bf16 %v42_v29, %v120_v33  ;;  %v51_v40 = vsel %vm50_vm4, %v48_v22, %v49_v23  ;;  %vm420_vm8 = vcmask 1043456   ;;  %v823_v46 = vmov 0.0   ;;  %v720_v31 = vld [vmem:[%s1037_s3 + $0x8] sm:$0xf] }
   0xe   :  { %vm123_vm6 = vcmp.eq.s32.totalorder %v69_v35, 15  ;;  %vm125_vm7 = vcmp.eq.s32.totalorder %v83_v39, 15  ;;  %764 = vmatprep.subr.bf16.mxu1 %v823_v46  ;;  %v422_v47 = vsel %vm420_vm8, %v717_v45, 0  ;;  %vm824_vm9 = vmmov 0   ;;  %770 = vmatprep.subr.bf16.mxu0 %v823_v46 }
   0xf   :  { %755 = vmatmul.mubr.msk.bf16.vlgmr.msra.gmra.mxu1 %vm145_vm1, %v139_v36  ;;  %v135_v41 = vsel %vm123_vm6, 0.0, %v52_v34  ;;  %v137_v43 = vsel %vm125_vm7, 0.0, %v54_v38  ;;  %v469_v49 = vsel %vm420_vm8, %v413_v48, 0  ;;  %vm356_vm10 = vcmask 64512  }
  0x10   :  { %v263_v42 = vpack.c.bf16 %v135_v41, %v53_v37  ;;  %v264_v44 = vpack.c.bf16 %v137_v43, %v51_v40  ;;  %766 = vmatprep.mubr.msk.bf16.mxu1 %vm824_vm9, %v823_v46  ;;  %765 = vmatpush3.bf16.msra.mxu1 %v422_v47  ;;  %v383_v28 = vand.u32 7, %v915_v30  ;;  %v376_v29 = vand.u32 7, %v898_v17  ;;  %v800_v17 = vld [vmem:[%s1040_s6] sm:$0xff]  }
  0x11   :  { %776 = vmatprep.subr.bf16.mxu1 %v823_v46  ;;  %v519_v37 = vsel %vm420_vm8, %v720_v31, 0  ;;  %vm581_vm15 = vcmask 130048  }
  0x12   :  { %760 = vmatprep.mubr.msk.bf16.mxu0 %vm145_vm1, %v263_v42  ;;  %vm967_vm11 = vcmp.eq.s32.totalorder %v376_v29, 0  ;;  %vm971_vm12 = vcmp.eq.s32.totalorder %v383_v28, 0  ;;  %vm976_vm13 = vcmp.eq.s32.totalorder %v376_v29, 7  ;;  %vm980_vm14 = vcmp.eq.s32.totalorder %v383_v28, 7 }
  0x13   :  { %761 = vmatmul.mubr.msk.bf16.vlgmr.msra.gmra.mxu0 %vm145_vm1, %v264_v44 }
  0x14   :  { %772 = vmatprep.mubr.msk.bf16.mxu0 %vm824_vm9, %v823_v46  ;;  %771 = vmatpush3.bf16.msra.mxu0 %v469_v49 }
  0x15   :  { %782 = vmatprep.subr.bf16.mxu0 %v823_v46 }
  0xc6   :  { %v750_v50 = vpop.f32.mrf.mxu0 }
  0xc8   :  { %v190_v51 = vpop.f32.mrf.mxu0 }
  0xca   :  { %v751_v52 = vpop.f32.mrf.mxu0 }
  0xcc   :  { %v193_v53 = vpop.f32.mrf.mxu0 }
  0xcf   :  { %v756_v54 = vpop.f32.mrf.mxu1 }
  0xd0   :  { %v257_v55 = vadd.f32 %v756_v54, %v750_v50 }
  0xd1   :  { %v248_v56 = vpop.f32.mrf.mxu1 }
  0xd2   :  { %v249_v57 = vadd.f32 %v248_v56, %v190_v51 }
  0xd3   :  { %v762_v58 = vpop.f32.mrf.mxu0  ;;  %v757_v60 = vpop.f32.mrf.mxu1 }
  0xd4   :  { %v327_v61 = vadd.f32 %v762_v58, %v257_v55  ;;  %v260_v62 = vadd.f32 %v757_v60, %v751_v52 }
  0xd5   :  { %v310_v63 = vpop.f32.mrf.mxu0  ;;  %v251_v0 = vpop.f32.mrf.mxu1 }
  0xd6   :  { %v338_v1 = vadd.f32 %v716_v59, %v327_v61  ;;  %v325_v2 = vadd.f32 %v310_v63, %v249_v57  ;;  %v252_v3 = vadd.f32 %v251_v0, %v193_v53  ;;  %v722_v63 = vld [vmem:[%s1038_s4] ss:$0 sm:$0xff] }
  0xd7   :  { %v763_v4 = vpop.f32.mrf.mxu0 }
  0xd8   :  { %v336_v5 = vadd.f32 %v716_v59, %v325_v2  ;;  %v328_v6 = vadd.f32 %v763_v4, %v260_v62  ;;  %v342_v8 = vmax.f32 %v338_v1, 0.0 }
  0xd9   :  { %v313_v7 = vpop.f32.mrf.mxu0 }
  0xda   :  { %v340_v9 = vmax.f32 %v336_v5, 0.0  ;;  %v339_v10 = vadd.f32 %v716_v59, %v328_v6  ;;  %v326_v11 = vadd.f32 %v313_v7, %v252_v3  ;;  %v346_v14 = vrot.slane %v342_v8, 1 }
  0xdc   :  { %v343_v12 = vmax.f32 %v339_v10, 0.0  ;;  %v337_v13 = vadd.f32 %v716_v59, %v326_v11  ;;  %v344_v15 = vrot.slane %v340_v9, 1 }
  0xde   :  { %v347_v16 = vrot.slane %v343_v12, 1  ;;  %v341_v18 = vmax.f32 %v337_v13, 0.0 }
  0xe0   :  { %v348_v19 = vsel %vm50_vm4, %v346_v14, %v347_v16  ;;  %v351_v20 = vsel %vm50_vm4, %v347_v16, %v344_v15  ;;  %v345_v21 = vrot.slane %v341_v18, 1 }
  0xe1   :  { %v354_v22 = vmax.f32 %v342_v8, %v348_v19  ;;  %v355_v23 = vmax.f32 %v343_v12, %v351_v20  ;;  %v585_v20 = vld [vmem:[%s1039_s5] sm:$0x1]  ;;  %s825_s5 = smov [#allocation4]  }
  0xe2   :  { %v349_v24 = vsel %vm50_vm4, %v345_v21, %v346_v14  ;;  %v350_v25 = vsel %vm50_vm4, %v344_v15, %v345_v21  ;;  %s700_s30 = sshll.u32 %s825_s5, 4  ;;  %s701_s30 = int_to_ptr.vmem [resolvable:$true] %s700_s30 }
  0xe3   :  { %359 = vst.msk [vmem:[#allocation2 + $0x10] sm:$0xff] %vm356_vm10, %v354_v22  ;;  %360 = vst.msk [vmem:[#allocation2 + $0x18] sm:$0xff] %vm356_vm10, %v355_v23  ;;  %v352_v26 = vmax.f32 %v340_v9, %v350_v25  ;;  %v353_v27 = vmax.f32 %v341_v18, %v349_v24  ;;  %s801_s6 = scalar_lea.vmem %s701_s30, 32  ;;  %p806_p1 = scmp.lt.s32.totalorder %s701_s30, %s701_s30 }
  0xe4   :  { %p802_p0 = scmp.ne.s32.totalorder %s701_s30, %s801_s6  ;;  %p807_p2 = scmp.lt.s32.totalorder %s801_s6, %s801_s6 }
  0xe5   :  { %357 = vst.msk [vmem:[#allocation2] sm:$0xff] %vm356_vm10, %v352_v26  ;;  %358 = vst.msk [vmem:[#allocation2 + $0x8] sm:$0xff] %vm356_vm10, %v353_v27  ;;  %v724_v27 = vld [vmem:[%s1041_s7] ss:$0 sm:$0xff] }
  0xe6   :  { %p808_p3 = por %p807_p2, %p806_p1 }
  0xe8   :  { %p809_p4 = pnand %p808_p3, %p802_p0 }
  0xea   :  { %v363_v32 = vld [vmem:[#allocation2 + $0x10] ss:$2 sm:$0xff] }
  0xeb   :  { %v365_v34 = vrot.slane %v363_v32, 7  ;;  %v369_v39 = vrot.slane %v363_v32, 1 }
  0xec   :  { %v361_v33 = vld [vmem:[#allocation2] ss:$2 sm:$0xff] }
  0xed   :  { %v364_v30 = vrot.slane %v361_v33, 7  ;;  %v368_v38 = vrot.slane %v361_v33, 1  ;;  %v414_v40 = vpack.c.bf16 %v363_v32, %v361_v33 }
  0xef   :  { %767 = vmatmul.mubr.msk.bf16.vlgmr.msra.gmra.mxu1 %vm356_vm10, %v414_v40  ;;  %v366_v43 = vsel %vm41_vm2, %v364_v30, %v365_v34  ;;  %v367_v44 = vsel %vm41_vm2, %v365_v34, %v364_v30  ;;  %v370_v45 = vsel %vm50_vm4, %v368_v38, %v369_v39  ;;  %v371_v47 = vsel %vm50_vm4, %v369_v39, %v368_v38 }
  0xf0   :  { %v402_v48 = vsel %vm967_vm11, 0.0, %v367_v44  ;;  %v403_v49 = vsel %vm971_vm12, 0.0, %v366_v43  ;;  %777 = vmatpush3.bf16.msra.mxu1 %v519_v37  ;;  %778 = vmatprep.mubr.msk.bf16.mxu1 %vm824_vm9, %v823_v46  ;;  %v410_v51 = vsel %vm976_vm13, 0.0, %v370_v45  ;;  %v411_v52 = vsel %vm980_vm14, 0.0, %v371_v47 }
  0xf1   :  { %v412_v50 = vpack.c.bf16 %v403_v49, %v402_v48  ;;  %788 = vmatprep.subr.bf16.mxu1 %v823_v46  ;;  %v512_v53 = vpack.c.bf16 %v411_v52, %v410_v51 }
  0xf3   :  { %773 = vmatmul.mubr.msk.bf16.vlgmr.msra.gmra.mxu0 %vm356_vm10, %v412_v50 }
  0xf4   :  { %784 = vmatprep.mubr.msk.bf16.mxu0 %vm824_vm9, %v823_v46 }
  0xf7   :  { %779 = vmatmul.mubr.msk.bf16.vlgmr.msra.gmra.mxu1 %vm356_vm10, %v512_v53 }
  0xf8   :  { %790 = vmatprep.mubr.msk.bf16.mxu1 %vm824_vm9, %v823_v46  ;;  %789 = vmatpush3.bf16.msra.mxu1 %v800_v17 }
 0x1af   :  { %v458_v54 = vpop.f32.mrf.mxu1 }
 0x1b1   :  { %v768_v55 = vpop.f32.mrf.mxu1 }
 0x1b3   :  { %v461_v56 = vpop.f32.mrf.mxu1  ;;  %v505_v57 = vpop.f32.mrf.mxu0 }
 0x1b4   :  { %v506_v60 = vadd.f32 %v505_v57, %v458_v54 }
 0x1b5   :  { %v769_v58 = vpop.f32.mrf.mxu1  ;;  %v774_v59 = vpop.f32.mrf.mxu0 }
 0x1b7   :  { %v508_v61 = vpop.f32.mrf.mxu0  ;;  %v555_v62 = vpop.f32.mrf.mxu1 }
 0x1b8   :  { %v562_v0 = vadd.f32 %v555_v62, %v506_v60  ;;  %v509_v3 = vadd.f32 %v508_v61, %v461_v56 }
 0x1b9   :  { %v775_v1 = vpop.f32.mrf.mxu0  ;;  %v780_v2 = vpop.f32.mrf.mxu1 }
 0x1ba   :  { %v571_v4 = vadd.f32 %v722_v63, %v562_v0 }
 0x1bb   :  { %v558_v5 = vpop.f32.mrf.mxu1 }
 0x1bc   :  { %v563_v46 = vadd.f32 %v558_v5, %v509_v3  ;;  %v573_v7 = vmax.f32 %v571_v4, 0.0 }
 0x1bd   :  { %v781_v6 = vpop.f32.mrf.mxu1 }
 0x1be   :  { %v572_v8 = vadd.f32 %v722_v63, %v563_v46  ;;  %v575_v10 = vrot.slane %v573_v7, 1 }
 0x1c0   :  { %v574_v9 = vmax.f32 %v572_v8, 0.0 }
 0x1c2   :  { %v576_v11 = vrot.slane %v574_v9, 1 }
 0x1c4   :  { %v577_v12 = vsel %vm50_vm4, %v575_v10, %v576_v11  ;;  %v578_v13 = vsel %vm50_vm4, %v576_v11, %v575_v10 }
 0x1c5   :  { %v579_v14 = vmax.f32 %v573_v7, %v577_v12  ;;  %v580_v15 = vmax.f32 %v574_v9, %v578_v13 }
 0x1c7   :  { %582 = vst.msk [vmem:[#allocation3] sm:$0xff] %vm581_vm15, %v579_v14  ;;  %583 = vst.msk [vmem:[#allocation3 + $0x8] sm:$0xff] %vm581_vm15, %v580_v15 }
 0x1ce   :  { %v584_v16 = vld [vmem:[#allocation3] ss:$2 sm:$0xff] }
 0x1cf   :  { %v586_v18 = vpack.c.bf16 %v584_v16, %v584_v16 }
 0x1d1   :  { %v591_v19 = vsel %vm420_vm8, %v586_v18, 0 }
 0x1d2   :  { %783 = vmatpush3.bf16.msra.mxu0 %v591_v19 }
 0x1d5   :  { %785 = vmatmul.mubr.msk.bf16.vlgmr.msra.gmra.mxu0 %vm356_vm10, %v585_v20 }
 0x295   :  { %v627_v21 = vpop.f32.mrf.mxu0 }
 0x296   :  { %v633_v22 = vmul.f32 0.25, %v627_v21 }
 0x297   :  { %v786_v23 = vpop.f32.mrf.mxu0 }
 0x298   :  { %v634_v24 = vpack.c.bf16 %v633_v22, %v633_v22 }
 0x299   :  { %v630_v25 = vpop.f32.mrf.mxu0 }
 0x29a   :  { %791 = vmatmul.mubr.msk.bf16.vlgmr.msra.gmra.mxu1 %vm581_vm15, %v634_v24 }
 0x29b   :  { %v787_v26 = vpop.f32.mrf.mxu0 }
 0x35a   :  { %v687_v28 = vpop.f32.mrf.mxu1 }
 0x35b   :  { %v688_v29 = vadd.f32 %v724_v27, %v687_v28 }
 0x35c   :  { %v792_v31 = vpop.f32.mrf.mxu1 }
 0x35d   :  { %693 = vst [vmem:[#allocation4] sm:$0x3] %v688_v29 }
 0x35e   :  { %v690_v32 = vpop.f32.mrf.mxu1 }
 0x35f   :  { %812 = shalt.err (!%p809_p4)
}
 0x360   :  { %703 = dma.vmem_to_hbm [thread:$0]  %s701_s30, 32, %s1042_s8, [#allocation5]   ;;  %v793_v33 = vpop.f32.mrf.mxu1 }
 0x361   :  { %821 = dma.done.wait [#allocation5], 32  }
 0x362   :  { %822 = vsyncadd [#allocation5], 4294967264 }
 0x363   :  { %707 = vsyncpa [#allocation5], 1 }

</bundles_post_ra>
